<compile_context>
chip_gen: v5e
topology: v5e:2x2
jax: 0.10.0
libtpu: 0.0.40
codegen_flags: <defaults>
</compile_context>

<pallas_src>
import math
import jax
import jax.numpy as jnp
from jax.experimental import pallas as pl
from jax.experimental.pallas import tpu as pltpu

# ---- model hyperparameters (small, consistent with the module) ----
EMBED_DIM = 32
NUM_HEADS = 4
DOWNSAMPLE_RATE = 1
INTERNAL_DIM = EMBED_DIM // DOWNSAMPLE_RATE
HEAD_DIM = INTERNAL_DIM // NUM_HEADS

BATCH = 2
N_Q = 8     # number of query tokens
N_K = 8     # number of key/value tokens

# Lane-dense output width: pad the out-projection to a multiple of 128 lanes so
# the final stores are full (unmasked) vector stores and the output DMA is dense.
OUT_LANES = ((EMBED_DIM + 127) // 128) * 128   # = 128


def _attention_kernel(tok_ref, w_in_ref, w_out_ref, out_ref):
    """Single invocation (no grid); the whole problem is VMEM-resident.

      tok_ref:   (B*(N_Q + 2*N_K), E)   rows = [q tokens; k tokens; v tokens]
      w_in_ref:  (E + 1, 3*I)           rows 0..E-1 = [wq*scale | wk | wv]
                                        row  E      = [bq*scale | bk | bv]
      w_out_ref: (I + 1, OUT_LANES)     rows 0..I-1 = wo (zero-padded to 128 lanes)
                                        row  I      = bo (zero-padded)
      out_ref:   (B, N_Q, OUT_LANES)    lane-dense; the wrapper slices [..., :E]
    """
    E, I, D = EMBED_DIM, INTERNAL_DIM, HEAD_DIM
    bnq = BATCH * N_Q
    bnk = BATCH * N_K

    w_in = w_in_ref[0:E, :]           # (E, 3I)
    b_in = w_in_ref[E:E + 1, :]       # (1, 3I)
    w_out = w_out_ref[0:I, :]         # (I, OUT_LANES)
    b_out = w_out_ref[I:I + 1, :]     # (1, OUT_LANES)

    # Fused q/k/v projection: ONE 2D MXU matmul over all tokens of all batches
    # plus one broadcast bias add.  The 1/sqrt(head_dim) attention scale was
    # folded into the q columns/bias at parameter-preparation time.
    tok = tok_ref[...]
    proj = jnp.dot(tok, w_in, preferred_element_type=jnp.float32) + b_in   # (48, 96)

    # Per-source blocks: rows select the token source, columns the projection.
    q_all = proj[0:bnq, 0:I]                              # (B*N_Q, I)
    k_all = proj[bnq:bnq + bnk, I:2 * I]                  # (B*N_K, I)
    v_all = proj[bnq + bnk:bnq + 2 * bnk, 2 * I:3 * I]    # (B*N_K, I)

    # Attention core: per (batch, head) 2D blocks.  All slices are static and
    # sublane/lane aligned; every matmul is a plain 2D MXU op (robust lowering,
    # identical MAC count to any fused formulation).  At these sizes the kernel
    # is overhead/DMA bound, so the unrolled tiny matmuls are free filler.
    for b in range(BATCH):
        q_b = q_all[b * N_Q:(b + 1) * N_Q, :]             # (N_Q, I)
        k_b = k_all[b * N_K:(b + 1) * N_K, :]             # (N_K, I)
        v_b = v_all[b * N_K:(b + 1) * N_K, :]             # (N_K, I)

        out_b = jnp.zeros((N_Q, OUT_LANES), jnp.float32)
        for h in range(NUM_HEADS):
            q_h = q_b[:, h * D:(h + 1) * D]               # (N_Q, D)
            k_h = k_b[:, h * D:(h + 1) * D]               # (N_K, D)
            v_h = v_b[:, h * D:(h + 1) * D]               # (N_K, D)

            # Scores: contract the D axis of both operands (no explicit k.T).
            s = jnp.einsum("qd,kd->qk", q_h, k_h,
                           preferred_element_type=jnp.float32)  # (N_Q, N_K)

            # Numerically-stable softmax with EXACT normalization (the approx
            # EUP reciprocal buys nothing in this DMA/overhead-bound regime).
            s = s - jnp.max(s, axis=-1, keepdims=True)
            p = jnp.exp(s)
            p = p / jnp.sum(p, axis=-1, keepdims=True)

            o_h = jnp.dot(p, v_h, preferred_element_type=jnp.float32)  # (N_Q, D)

            # Per-head slice of the (un-replicated, lane-padded) output
            # projection; summing head contributions is a lane-dense VPU add —
            # no cross-sublane head reduction, no replicated wo.
            out_b = out_b + jnp.dot(o_h, w_out[h * D:(h + 1) * D, :],
                                    preferred_element_type=jnp.float32)

        out_ref[b, :, :] = (out_b + b_out).astype(out_ref.dtype)


# ---------------- wrapper-side (one-time) parameter re-layout ----------------

def prepare_params(params):
    """One-time parameter re-layout (NOT per forward call)."""
    wq, bq, wk, bk, wv, bv, wo, bo = params
    scale = 1.0 / math.sqrt(HEAD_DIM)

    # Fused input projection: columns [wq*scale | wk | wv]; last row = biases.
    w_in = jnp.concatenate([wq * scale, wk, wv], axis=1)          # (E, 3I)
    b_in = jnp.concatenate([bq * scale, bk, bv], axis=1)          # (1, 3I)
    w_in_b = jnp.concatenate([w_in, b_in], axis=0).astype(jnp.float32)   # (E+1, 3I)

    # Output projection zero-padded to 128 lanes (lane-dense kernel output);
    # last row carries the bias.
    wo_pad = jnp.zeros((INTERNAL_DIM, OUT_LANES), jnp.float32).at[:, :EMBED_DIM].set(wo)
    bo_pad = jnp.zeros((1, OUT_LANES), jnp.float32).at[:, :EMBED_DIM].set(bo)
    w_out_b = jnp.concatenate([wo_pad, bo_pad], axis=0)           # (I+1, 128)
    return w_in_b, w_out_b


def attention_pallas(q, k, v, prepared):
    """q: (B, N_Q, E), k/v: (B, N_K, E). Returns (B, N_Q, E)."""
    w_in_b, w_out_b = prepared
    B, nq, E = q.shape
    _, nk, _ = k.shape

    # Stack all token sources row-wise: one small concat, three kernel inputs.
    tok = jnp.concatenate([q.reshape(B * nq, E),
                           k.reshape(B * nk, E),
                           v.reshape(B * nk, E)], axis=0)          # (B*(nq+2nk), E)

    flops = (2 * tok.shape[0] * E * w_in_b.shape[1]                # fused projection
             + B * NUM_HEADS * (2 * nq * nk * HEAD_DIM             # scores
                                + 2 * nq * nk * HEAD_DIM           # p @ v
                                + 2 * nq * HEAD_DIM * OUT_LANES))  # out projection
    bytes_accessed = 4 * (tok.size + w_in_b.size + w_out_b.size + B * nq * OUT_LANES)
    cost = pl.CostEstimate(flops=int(flops),
                           transcendentals=int(B * NUM_HEADS * nq * nk),
                           bytes_accessed=int(bytes_accessed))

    out = pl.pallas_call(
        _attention_kernel,
        out_shape=jax.ShapeDtypeStruct((B, nq, OUT_LANES), q.dtype),
        in_specs=[pl.BlockSpec(memory_space=pltpu.MemorySpace.VMEM)] * 3,
        out_specs=pl.BlockSpec(memory_space=pltpu.MemorySpace.VMEM),
        cost_estimate=cost,
    )(tok, w_in_b, w_out_b)

    # Drop the lane padding back to the true embedding width.
    return out[..., :E]


# -------------------------- pure-JAX reference --------------------------

def attention_reference(q, k, v, params):
    """Plain-JAX reference mirroring the PyTorch forward exactly."""
    wq, bq, wk, bk, wv, bv, wo, bo = params
    hi = jax.lax.Precision.HIGHEST
    qp = jnp.matmul(q, wq, precision=hi) + bq[0]
    kp = jnp.matmul(k, wk, precision=hi) + bk[0]
    vp = jnp.matmul(v, wv, precision=hi) + bv[0]

    def sep(x):
        b, n, c = x.shape
        return x.reshape(b, n, NUM_HEADS, c // NUM_HEADS).transpose(0, 2, 1, 3)

    qh, kh, vh = sep(qp), sep(kp), sep(vp)
    attn = jnp.matmul(qh, jnp.swapaxes(kh, -1, -2), precision=hi) / math.sqrt(HEAD_DIM)
    attn = jax.nn.softmax(attn, axis=-1)
    out = jnp.matmul(attn, vh, precision=hi)
    b, h, n, d = out.shape
    out = out.transpose(0, 2, 1, 3).reshape(b, n, h * d)
    return jnp.matmul(out, wo, precision=hi) + bo[0]


def init_params(key):
    """Deterministic parameter init (shapes follow nn.Linear in the module)."""
    ks = jax.random.split(key, 8)
    scale_in = 1.0 / math.sqrt(EMBED_DIM)
    scale_mid = 1.0 / math.sqrt(INTERNAL_DIM)
    wq = jax.random.uniform(ks[0], (EMBED_DIM, INTERNAL_DIM), jnp.float32, -scale_in, scale_in)
    bq = jax.random.uniform(ks[1], (1, INTERNAL_DIM), jnp.float32, -scale_in, scale_in)
    wk = jax.random.uniform(ks[2], (EMBED_DIM, INTERNAL_DIM), jnp.float32, -scale_in, scale_in)
    bk = jax.random.uniform(ks[3], (1, INTERNAL_DIM), jnp.float32, -scale_in, scale_in)
    wv = jax.random.uniform(ks[4], (EMBED_DIM, INTERNAL_DIM), jnp.float32, -scale_in, scale_in)
    bv = jax.random.uniform(ks[5], (1, INTERNAL_DIM), jnp.float32, -scale_in, scale_in)
    wo = jax.random.uniform(ks[6], (INTERNAL_DIM, EMBED_DIM), jnp.float32, -scale_mid, scale_mid)
    bo = jax.random.uniform(ks[7], (1, EMBED_DIM), jnp.float32, -scale_mid, scale_mid)
    return (wq, bq, wk, bk, wv, bv, wo, bo)


if __name__ == "__main__":
    key = jax.random.PRNGKey(0)
    k_params, k_q, k_k, k_v = jax.random.split(key, 4)

    params = init_params(k_params)
    q = jax.random.normal(k_q, (BATCH, N_Q, EMBED_DIM), jnp.float32)
    k = jax.random.normal(k_k, (BATCH, N_K, EMBED_DIM), jnp.float32)
    v = jax.random.normal(k_v, (BATCH, N_K, EMBED_DIM), jnp.float32)

    prepared = prepare_params(params)          # one-time weight re-layout
    attn_fn = jax.jit(attention_pallas)
    out = attn_fn(q, k, v, prepared)
    out = jax.block_until_ready(out)

    ref = attention_reference(q, k, v, params)
    assert out.shape == (BATCH, N_Q, EMBED_DIM)
    assert jnp.allclose(out, ref, rtol=1e-3, atol=1e-3), "mismatch vs reference"

    print("KERNEL_OK")
</pallas_src>

<mosaic_0001>
module attributes {stable_mosaic.version = 11 : i64} {
  func.func @_attention_kernel(%arg0: memref<48x32xf32, #tpu.memory_space<vmem>>, %arg1: memref<33x96xf32, #tpu.memory_space<vmem>>, %arg2: memref<33x128xf32, #tpu.memory_space<vmem>>, %arg3: memref<2x8x128xf32, #tpu.memory_space<vmem>>) attributes {dimension_semantics = [], scalar_prefetch = 0 : i64, scratch_operands = 0 : i64, tpu.core_type = #tpu.core_type<tc>} {
    %c0 = arith.constant 0 : index
    %c0_0 = arith.constant 0 : index
    %0 = vector.load %arg1[%c0, %c0_0] : memref<33x96xf32, #tpu.memory_space<vmem>>, vector<32x96xf32>
    %c32 = arith.constant 32 : index
    %c0_1 = arith.constant 0 : index
    %1 = vector.load %arg1[%c32, %c0_1] : memref<33x96xf32, #tpu.memory_space<vmem>>, vector<1x96xf32>
    %c0_2 = arith.constant 0 : index
    %c0_3 = arith.constant 0 : index
    %2 = vector.load %arg2[%c0_2, %c0_3] : memref<33x128xf32, #tpu.memory_space<vmem>>, vector<32x128xf32>
    %c32_4 = arith.constant 32 : index
    %c0_5 = arith.constant 0 : index
    %3 = vector.load %arg2[%c32_4, %c0_5] : memref<33x128xf32, #tpu.memory_space<vmem>>, vector<1x128xf32>
    %c0_6 = arith.constant 0 : index
    %c0_7 = arith.constant 0 : index
    %4 = vector.load %arg0[%c0_6, %c0_7] : memref<48x32xf32, #tpu.memory_space<vmem>>, vector<48x32xf32>
    %cst = arith.constant dense<0.000000e+00> : vector<48x96xf32>
    %5 = tpu.matmul %4, %0, %cst {dimension_numbers = #tpu.dot_dimension_numbers<[1], [0], [0], [1], [0, 0, 1, 1], [], []>} : vector<48x32xf32>, vector<32x96xf32>, vector<48x96xf32> -> vector<48x96xf32>
    %6 = vector.broadcast %1 : vector<1x96xf32> to vector<48x96xf32>
    %7 = arith.addf %5, %6 : vector<48x96xf32>
    %8 = vector.extract_strided_slice %7 {offsets = [0, 0], sizes = [16, 32], strides = [1, 1]} : vector<48x96xf32> to vector<16x32xf32>
    %9 = vector.extract_strided_slice %7 {offsets = [16, 32], sizes = [16, 32], strides = [1, 1]} : vector<48x96xf32> to vector<16x32xf32>
    %10 = vector.extract_strided_slice %7 {offsets = [32, 64], sizes = [16, 32], strides = [1, 1]} : vector<48x96xf32> to vector<16x32xf32>
    %11 = vector.extract_strided_slice %8 {offsets = [0, 0], sizes = [8, 32], strides = [1, 1]} : vector<16x32xf32> to vector<8x32xf32>
    %12 = vector.extract_strided_slice %9 {offsets = [0, 0], sizes = [8, 32], strides = [1, 1]} : vector<16x32xf32> to vector<8x32xf32>
    %13 = vector.extract_strided_slice %10 {offsets = [0, 0], sizes = [8, 32], strides = [1, 1]} : vector<16x32xf32> to vector<8x32xf32>
    %cst_8 = arith.constant 0.000000e+00 : f32
    %14 = vector.broadcast %cst_8 : f32 to vector<8x128xf32>
    %15 = vector.extract_strided_slice %11 {offsets = [0, 0], sizes = [8, 8], strides = [1, 1]} : vector<8x32xf32> to vector<8x8xf32>
    %16 = vector.extract_strided_slice %12 {offsets = [0, 0], sizes = [8, 8], strides = [1, 1]} : vector<8x32xf32> to vector<8x8xf32>
    %17 = vector.extract_strided_slice %13 {offsets = [0, 0], sizes = [8, 8], strides = [1, 1]} : vector<8x32xf32> to vector<8x8xf32>
    "tpu.trace_start"() <{level = 10 : i32, message = "qd,kd->qk"}> : () -> ()
    %cst_9 = arith.constant dense<0.000000e+00> : vector<8x8xf32>
    %18 = tpu.matmul %15, %16, %cst_9 {dimension_numbers = #tpu.dot_dimension_numbers<[1], [1], [0], [0], [0, 0, 1, 0], [], []>} : vector<8x8xf32>, vector<8x8xf32>, vector<8x8xf32> -> vector<8x8xf32>
    "tpu.trace_stop"() : () -> ()
    %cst_10 = arith.constant dense<0xFF800000> : vector<8xf32>
    %19 = vector.multi_reduction <maximumf>, %18, %cst_10 [1] : vector<8x8xf32> to vector<8xf32>
    %20 = vector.shape_cast %19 : vector<8xf32> to vector<8x1xf32>
    %21 = vector.broadcast %20 : vector<8x1xf32> to vector<8x8xf32>
    %22 = arith.subf %18, %21 : vector<8x8xf32>
    %23 = math.exp %22 : vector<8x8xf32>
    %cst_11 = arith.constant dense<0.000000e+00> : vector<8xf32>
    %24 = vector.multi_reduction <add>, %23, %cst_11 [1] : vector<8x8xf32> to vector<8xf32>
    %25 = vector.shape_cast %24 : vector<8xf32> to vector<8x1xf32>
    %26 = vector.broadcast %25 : vector<8x1xf32> to vector<8x8xf32>
    %27 = arith.divf %23, %26 : vector<8x8xf32>
    %cst_12 = arith.constant dense<0.000000e+00> : vector<8x8xf32>
    %28 = tpu.matmul %27, %17, %cst_12 {dimension_numbers = #tpu.dot_dimension_numbers<[1], [0], [0], [1], [0, 0, 1, 1], [], []>} : vector<8x8xf32>, vector<8x8xf32>, vector<8x8xf32> -> vector<8x8xf32>
    %29 = vector.extract_strided_slice %2 {offsets = [0, 0], sizes = [8, 128], strides = [1, 1]} : vector<32x128xf32> to vector<8x128xf32>
    %cst_13 = arith.constant dense<0.000000e+00> : vector<8x128xf32>
    %30 = tpu.matmul %28, %29, %cst_13 {dimension_numbers = #tpu.dot_dimension_numbers<[1], [0], [0], [1], [0, 0, 1, 1], [], []>} : vector<8x8xf32>, vector<8x128xf32>, vector<8x128xf32> -> vector<8x128xf32>
    %31 = arith.addf %14, %30 : vector<8x128xf32>
    %32 = vector.extract_strided_slice %11 {offsets = [0, 8], sizes = [8, 8], strides = [1, 1]} : vector<8x32xf32> to vector<8x8xf32>
    %33 = vector.extract_strided_slice %12 {offsets = [0, 8], sizes = [8, 8], strides = [1, 1]} : vector<8x32xf32> to vector<8x8xf32>
    %34 = vector.extract_strided_slice %13 {offsets = [0, 8], sizes = [8, 8], strides = [1, 1]} : vector<8x32xf32> to vector<8x8xf32>
    "tpu.trace_start"() <{level = 10 : i32, message = "qd,kd->qk"}> : () -> ()
    %cst_14 = arith.constant dense<0.000000e+00> : vector<8x8xf32>
    %35 = tpu.matmul %32, %33, %cst_14 {dimension_numbers = #tpu.dot_dimension_numbers<[1], [1], [0], [0], [0, 0, 1, 0], [], []>} : vector<8x8xf32>, vector<8x8xf32>, vector<8x8xf32> -> vector<8x8xf32>
    "tpu.trace_stop"() : () -> ()
    %cst_15 = arith.constant dense<0xFF800000> : vector<8xf32>
    %36 = vector.multi_reduction <maximumf>, %35, %cst_15 [1] : vector<8x8xf32> to vector<8xf32>
    %37 = vector.shape_cast %36 : vector<8xf32> to vector<8x1xf32>
    %38 = vector.broadcast %37 : vector<8x1xf32> to vector<8x8xf32>
    %39 = arith.subf %35, %38 : vector<8x8xf32>
    %40 = math.exp %39 : vector<8x8xf32>
    %cst_16 = arith.constant dense<0.000000e+00> : vector<8xf32>
    %41 = vector.multi_reduction <add>, %40, %cst_16 [1] : vector<8x8xf32> to vector<8xf32>
    %42 = vector.shape_cast %41 : vector<8xf32> to vector<8x1xf32>
    %43 = vector.broadcast %42 : vector<8x1xf32> to vector<8x8xf32>
    %44 = arith.divf %40, %43 : vector<8x8xf32>
    %cst_17 = arith.constant dense<0.000000e+00> : vector<8x8xf32>
    %45 = tpu.matmul %44, %34, %cst_17 {dimension_numbers = #tpu.dot_dimension_numbers<[1], [0], [0], [1], [0, 0, 1, 1], [], []>} : vector<8x8xf32>, vector<8x8xf32>, vector<8x8xf32> -> vector<8x8xf32>
    %46 = vector.extract_strided_slice %2 {offsets = [8, 0], sizes = [8, 128], strides = [1, 1]} : vector<32x128xf32> to vector<8x128xf32>
    %cst_18 = arith.constant dense<0.000000e+00> : vector<8x128xf32>
    %47 = tpu.matmul %45, %46, %cst_18 {dimension_numbers = #tpu.dot_dimension_numbers<[1], [0], [0], [1], [0, 0, 1, 1], [], []>} : vector<8x8xf32>, vector<8x128xf32>, vector<8x128xf32> -> vector<8x128xf32>
    %48 = arith.addf %31, %47 : vector<8x128xf32>
    %49 = vector.extract_strided_slice %11 {offsets = [0, 16], sizes = [8, 8], strides = [1, 1]} : vector<8x32xf32> to vector<8x8xf32>
    %50 = vector.extract_strided_slice %12 {offsets = [0, 16], sizes = [8, 8], strides = [1, 1]} : vector<8x32xf32> to vector<8x8xf32>
    %51 = vector.extract_strided_slice %13 {offsets = [0, 16], sizes = [8, 8], strides = [1, 1]} : vector<8x32xf32> to vector<8x8xf32>
    "tpu.trace_start"() <{level = 10 : i32, message = "qd,kd->qk"}> : () -> ()
    %cst_19 = arith.constant dense<0.000000e+00> : vector<8x8xf32>
    %52 = tpu.matmul %49, %50, %cst_19 {dimension_numbers = #tpu.dot_dimension_numbers<[1], [1], [0], [0], [0, 0, 1, 0], [], []>} : vector<8x8xf32>, vector<8x8xf32>, vector<8x8xf32> -> vector<8x8xf32>
    "tpu.trace_stop"() : () -> ()
    %cst_20 = arith.constant dense<0xFF800000> : vector<8xf32>
    %53 = vector.multi_reduction <maximumf>, %52, %cst_20 [1] : vector<8x8xf32> to vector<8xf32>
    %54 = vector.shape_cast %53 : vector<8xf32> to vector<8x1xf32>
    %55 = vector.broadcast %54 : vector<8x1xf32> to vector<8x8xf32>
    %56 = arith.subf %52, %55 : vector<8x8xf32>
    %57 = math.exp %56 : vector<8x8xf32>
    %cst_21 = arith.constant dense<0.000000e+00> : vector<8xf32>
    %58 = vector.multi_reduction <add>, %57, %cst_21 [1] : vector<8x8xf32> to vector<8xf32>
    %59 = vector.shape_cast %58 : vector<8xf32> to vector<8x1xf32>
    %60 = vector.broadcast %59 : vector<8x1xf32> to vector<8x8xf32>
    %61 = arith.divf %57, %60 : vector<8x8xf32>
    %cst_22 = arith.constant dense<0.000000e+00> : vector<8x8xf32>
    %62 = tpu.matmul %61, %51, %cst_22 {dimension_numbers = #tpu.dot_dimension_numbers<[1], [0], [0], [1], [0, 0, 1, 1], [], []>} : vector<8x8xf32>, vector<8x8xf32>, vector<8x8xf32> -> vector<8x8xf32>
    %63 = vector.extract_strided_slice %2 {offsets = [16, 0], sizes = [8, 128], strides = [1, 1]} : vector<32x128xf32> to vector<8x128xf32>
    %cst_23 = arith.constant dense<0.000000e+00> : vector<8x128xf32>
    %64 = tpu.matmul %62, %63, %cst_23 {dimension_numbers = #tpu.dot_dimension_numbers<[1], [0], [0], [1], [0, 0, 1, 1], [], []>} : vector<8x8xf32>, vector<8x128xf32>, vector<8x128xf32> -> vector<8x128xf32>
    %65 = arith.addf %48, %64 : vector<8x128xf32>
    %66 = vector.extract_strided_slice %11 {offsets = [0, 24], sizes = [8, 8], strides = [1, 1]} : vector<8x32xf32> to vector<8x8xf32>
    %67 = vector.extract_strided_slice %12 {offsets = [0, 24], sizes = [8, 8], strides = [1, 1]} : vector<8x32xf32> to vector<8x8xf32>
    %68 = vector.extract_strided_slice %13 {offsets = [0, 24], sizes = [8, 8], strides = [1, 1]} : vector<8x32xf32> to vector<8x8xf32>
    "tpu.trace_start"() <{level = 10 : i32, message = "qd,kd->qk"}> : () -> ()
    %cst_24 = arith.constant dense<0.000000e+00> : vector<8x8xf32>
    %69 = tpu.matmul %66, %67, %cst_24 {dimension_numbers = #tpu.dot_dimension_numbers<[1], [1], [0], [0], [0, 0, 1, 0], [], []>} : vector<8x8xf32>, vector<8x8xf32>, vector<8x8xf32> -> vector<8x8xf32>
    "tpu.trace_stop"() : () -> ()
    %cst_25 = arith.constant dense<0xFF800000> : vector<8xf32>
    %70 = vector.multi_reduction <maximumf>, %69, %cst_25 [1] : vector<8x8xf32> to vector<8xf32>
    %71 = vector.shape_cast %70 : vector<8xf32> to vector<8x1xf32>
    %72 = vector.broadcast %71 : vector<8x1xf32> to vector<8x8xf32>
    %73 = arith.subf %69, %72 : vector<8x8xf32>
    %74 = math.exp %73 : vector<8x8xf32>
    %cst_26 = arith.constant dense<0.000000e+00> : vector<8xf32>
    %75 = vector.multi_reduction <add>, %74, %cst_26 [1] : vector<8x8xf32> to vector<8xf32>
    %76 = vector.shape_cast %75 : vector<8xf32> to vector<8x1xf32>
    %77 = vector.broadcast %76 : vector<8x1xf32> to vector<8x8xf32>
    %78 = arith.divf %74, %77 : vector<8x8xf32>
    %cst_27 = arith.constant dense<0.000000e+00> : vector<8x8xf32>
    %79 = tpu.matmul %78, %68, %cst_27 {dimension_numbers = #tpu.dot_dimension_numbers<[1], [0], [0], [1], [0, 0, 1, 1], [], []>} : vector<8x8xf32>, vector<8x8xf32>, vector<8x8xf32> -> vector<8x8xf32>
    %80 = vector.extract_strided_slice %2 {offsets = [24, 0], sizes = [8, 128], strides = [1, 1]} : vector<32x128xf32> to vector<8x128xf32>
    %cst_28 = arith.constant dense<0.000000e+00> : vector<8x128xf32>
    %81 = tpu.matmul %79, %80, %cst_28 {dimension_numbers = #tpu.dot_dimension_numbers<[1], [0], [0], [1], [0, 0, 1, 1], [], []>} : vector<8x8xf32>, vector<8x128xf32>, vector<8x128xf32> -> vector<8x128xf32>
    %82 = arith.addf %65, %81 : vector<8x128xf32>
    %83 = vector.broadcast %3 : vector<1x128xf32> to vector<8x128xf32>
    %84 = arith.addf %82, %83 : vector<8x128xf32>
    %c0_29 = arith.constant 0 : index
    %c0_30 = arith.constant 0 : index
    %c0_31 = arith.constant 0 : index
    %85 = vector.load %arg3[%c0_29, %c0_30, %c0_31] : memref<2x8x128xf32, #tpu.memory_space<vmem>>, vector<1x8x128xf32>
    %86 = vector.shape_cast %85 : vector<1x8x128xf32> to vector<8x128xf32>
    %87 = vector.shape_cast %84 : vector<8x128xf32> to vector<1x8x128xf32>
    tpu.vector_store %arg3[%c0_29, %c0_30, %c0_31], %87 {strides = array<i32>} : memref<2x8x128xf32, #tpu.memory_space<vmem>>, vector<1x8x128xf32>,
    %88 = vector.extract_strided_slice %8 {offsets = [8, 0], sizes = [8, 32], strides = [1, 1]} : vector<16x32xf32> to vector<8x32xf32>
    %89 = vector.extract_strided_slice %9 {offsets = [8, 0], sizes = [8, 32], strides = [1, 1]} : vector<16x32xf32> to vector<8x32xf32>
    %90 = vector.extract_strided_slice %10 {offsets = [8, 0], sizes = [8, 32], strides = [1, 1]} : vector<16x32xf32> to vector<8x32xf32>
    %cst_32 = arith.constant 0.000000e+00 : f32
    %91 = vector.broadcast %cst_32 : f32 to vector<8x128xf32>
    %92 = vector.extract_strided_slice %88 {offsets = [0, 0], sizes = [8, 8], strides = [1, 1]} : vector<8x32xf32> to vector<8x8xf32>
    %93 = vector.extract_strided_slice %89 {offsets = [0, 0], sizes = [8, 8], strides = [1, 1]} : vector<8x32xf32> to vector<8x8xf32>
    %94 = vector.extract_strided_slice %90 {offsets = [0, 0], sizes = [8, 8], strides = [1, 1]} : vector<8x32xf32> to vector<8x8xf32>
    "tpu.trace_start"() <{level = 10 : i32, message = "qd,kd->qk"}> : () -> ()
    %cst_33 = arith.constant dense<0.000000e+00> : vector<8x8xf32>
    %95 = tpu.matmul %92, %93, %cst_33 {dimension_numbers = #tpu.dot_dimension_numbers<[1], [1], [0], [0], [0, 0, 1, 0], [], []>} : vector<8x8xf32>, vector<8x8xf32>, vector<8x8xf32> -> vector<8x8xf32>
    "tpu.trace_stop"() : () -> ()
    %cst_34 = arith.constant dense<0xFF800000> : vector<8xf32>
    %96 = vector.multi_reduction <maximumf>, %95, %cst_34 [1] : vector<8x8xf32> to vector<8xf32>
    %97 = vector.shape_cast %96 : vector<8xf32> to vector<8x1xf32>
    %98 = vector.broadcast %97 : vector<8x1xf32> to vector<8x8xf32>
    %99 = arith.subf %95, %98 : vector<8x8xf32>
    %100 = math.exp %99 : vector<8x8xf32>
    %cst_35 = arith.constant dense<0.000000e+00> : vector<8xf32>
    %101 = vector.multi_reduction <add>, %100, %cst_35 [1] : vector<8x8xf32> to vector<8xf32>
    %102 = vector.shape_cast %101 : vector<8xf32> to vector<8x1xf32>
    %103 = vector.broadcast %102 : vector<8x1xf32> to vector<8x8xf32>
    %104 = arith.divf %100, %103 : vector<8x8xf32>
    %cst_36 = arith.constant dense<0.000000e+00> : vector<8x8xf32>
    %105 = tpu.matmul %104, %94, %cst_36 {dimension_numbers = #tpu.dot_dimension_numbers<[1], [0], [0], [1], [0, 0, 1, 1], [], []>} : vector<8x8xf32>, vector<8x8xf32>, vector<8x8xf32> -> vector<8x8xf32>
    %106 = vector.extract_strided_slice %2 {offsets = [0, 0], sizes = [8, 128], strides = [1, 1]} : vector<32x128xf32> to vector<8x128xf32>
    %cst_37 = arith.constant dense<0.000000e+00> : vector<8x128xf32>
    %107 = tpu.matmul %105, %106, %cst_37 {dimension_numbers = #tpu.dot_dimension_numbers<[1], [0], [0], [1], [0, 0, 1, 1], [], []>} : vector<8x8xf32>, vector<8x128xf32>, vector<8x128xf32> -> vector<8x128xf32>
    %108 = arith.addf %91, %107 : vector<8x128xf32>
    %109 = vector.extract_strided_slice %88 {offsets = [0, 8], sizes = [8, 8], strides = [1, 1]} : vector<8x32xf32> to vector<8x8xf32>
    %110 = vector.extract_strided_slice %89 {offsets = [0, 8], sizes = [8, 8], strides = [1, 1]} : vector<8x32xf32> to vector<8x8xf32>
    %111 = vector.extract_strided_slice %90 {offsets = [0, 8], sizes = [8, 8], strides = [1, 1]} : vector<8x32xf32> to vector<8x8xf32>
    "tpu.trace_start"() <{level = 10 : i32, message = "qd,kd->qk"}> : () -> ()
    %cst_38 = arith.constant dense<0.000000e+00> : vector<8x8xf32>
    %112 = tpu.matmul %109, %110, %cst_38 {dimension_numbers = #tpu.dot_dimension_numbers<[1], [1], [0], [0], [0, 0, 1, 0], [], []>} : vector<8x8xf32>, vector<8x8xf32>, vector<8x8xf32> -> vector<8x8xf32>
    "tpu.trace_stop"() : () -> ()
    %cst_39 = arith.constant dense<0xFF800000> : vector<8xf32>
    %113 = vector.multi_reduction <maximumf>, %112, %cst_39 [1] : vector<8x8xf32> to vector<8xf32>
    %114 = vector.shape_cast %113 : vector<8xf32> to vector<8x1xf32>
    %115 = vector.broadcast %114 : vector<8x1xf32> to vector<8x8xf32>
    %116 = arith.subf %112, %115 : vector<8x8xf32>
    %117 = math.exp %116 : vector<8x8xf32>
    %cst_40 = arith.constant dense<0.000000e+00> : vector<8xf32>
    %118 = vector.multi_reduction <add>, %117, %cst_40 [1] : vector<8x8xf32> to vector<8xf32>
    %119 = vector.shape_cast %118 : vector<8xf32> to vector<8x1xf32>
    %120 = vector.broadcast %119 : vector<8x1xf32> to vector<8x8xf32>
    %121 = arith.divf %117, %120 : vector<8x8xf32>
    %cst_41 = arith.constant dense<0.000000e+00> : vector<8x8xf32>
    %122 = tpu.matmul %121, %111, %cst_41 {dimension_numbers = #tpu.dot_dimension_numbers<[1], [0], [0], [1], [0, 0, 1, 1], [], []>} : vector<8x8xf32>, vector<8x8xf32>, vector<8x8xf32> -> vector<8x8xf32>
    %123 = vector.extract_strided_slice %2 {offsets = [8, 0], sizes = [8, 128], strides = [1, 1]} : vector<32x128xf32> to vector<8x128xf32>
    %cst_42 = arith.constant dense<0.000000e+00> : vector<8x128xf32>
    %124 = tpu.matmul %122, %123, %cst_42 {dimension_numbers = #tpu.dot_dimension_numbers<[1], [0], [0], [1], [0, 0, 1, 1], [], []>} : vector<8x8xf32>, vector<8x128xf32>, vector<8x128xf32> -> vector<8x128xf32>
    %125 = arith.addf %108, %124 : vector<8x128xf32>
    %126 = vector.extract_strided_slice %88 {offsets = [0, 16], sizes = [8, 8], strides = [1, 1]} : vector<8x32xf32> to vector<8x8xf32>
    %127 = vector.extract_strided_slice %89 {offsets = [0, 16], sizes = [8, 8], strides = [1, 1]} : vector<8x32xf32> to vector<8x8xf32>
    %128 = vector.extract_strided_slice %90 {offsets = [0, 16], sizes = [8, 8], strides = [1, 1]} : vector<8x32xf32> to vector<8x8xf32>
    "tpu.trace_start"() <{level = 10 : i32, message = "qd,kd->qk"}> : () -> ()
    %cst_43 = arith.constant dense<0.000000e+00> : vector<8x8xf32>
    %129 = tpu.matmul %126, %127, %cst_43 {dimension_numbers = #tpu.dot_dimension_numbers<[1], [1], [0], [0], [0, 0, 1, 0], [], []>} : vector<8x8xf32>, vector<8x8xf32>, vector<8x8xf32> -> vector<8x8xf32>
    "tpu.trace_stop"() : () -> ()
    %cst_44 = arith.constant dense<0xFF800000> : vector<8xf32>
    %130 = vector.multi_reduction <maximumf>, %129, %cst_44 [1] : vector<8x8xf32> to vector<8xf32>
    %131 = vector.shape_cast %130 : vector<8xf32> to vector<8x1xf32>
    %132 = vector.broadcast %131 : vector<8x1xf32> to vector<8x8xf32>
    %133 = arith.subf %129, %132 : vector<8x8xf32>
    %134 = math.exp %133 : vector<8x8xf32>
    %cst_45 = arith.constant dense<0.000000e+00> : vector<8xf32>
    %135 = vector.multi_reduction <add>, %134, %cst_45 [1] : vector<8x8xf32> to vector<8xf32>
    %136 = vector.shape_cast %135 : vector<8xf32> to vector<8x1xf32>
    %137 = vector.broadcast %136 : vector<8x1xf32> to vector<8x8xf32>
    %138 = arith.divf %134, %137 : vector<8x8xf32>
    %cst_46 = arith.constant dense<0.000000e+00> : vector<8x8xf32>
    %139 = tpu.matmul %138, %128, %cst_46 {dimension_numbers = #tpu.dot_dimension_numbers<[1], [0], [0], [1], [0, 0, 1, 1], [], []>} : vector<8x8xf32>, vector<8x8xf32>, vector<8x8xf32> -> vector<8x8xf32>
    %140 = vector.extract_strided_slice %2 {offsets = [16, 0], sizes = [8, 128], strides = [1, 1]} : vector<32x128xf32> to vector<8x128xf32>
    %cst_47 = arith.constant dense<0.000000e+00> : vector<8x128xf32>
    %141 = tpu.matmul %139, %140, %cst_47 {dimension_numbers = #tpu.dot_dimension_numbers<[1], [0], [0], [1], [0, 0, 1, 1], [], []>} : vector<8x8xf32>, vector<8x128xf32>, vector<8x128xf32> -> vector<8x128xf32>
    %142 = arith.addf %125, %141 : vector<8x128xf32>
    %143 = vector.extract_strided_slice %88 {offsets = [0, 24], sizes = [8, 8], strides = [1, 1]} : vector<8x32xf32> to vector<8x8xf32>
    %144 = vector.extract_strided_slice %89 {offsets = [0, 24], sizes = [8, 8], strides = [1, 1]} : vector<8x32xf32> to vector<8x8xf32>
    %145 = vector.extract_strided_slice %90 {offsets = [0, 24], sizes = [8, 8], strides = [1, 1]} : vector<8x32xf32> to vector<8x8xf32>
    "tpu.trace_start"() <{level = 10 : i32, message = "qd,kd->qk"}> : () -> ()
    %cst_48 = arith.constant dense<0.000000e+00> : vector<8x8xf32>
    %146 = tpu.matmul %143, %144, %cst_48 {dimension_numbers = #tpu.dot_dimension_numbers<[1], [1], [0], [0], [0, 0, 1, 0], [], []>} : vector<8x8xf32>, vector<8x8xf32>, vector<8x8xf32> -> vector<8x8xf32>
    "tpu.trace_stop"() : () -> ()
    %cst_49 = arith.constant dense<0xFF800000> : vector<8xf32>
    %147 = vector.multi_reduction <maximumf>, %146, %cst_49 [1] : vector<8x8xf32> to vector<8xf32>
    %148 = vector.shape_cast %147 : vector<8xf32> to vector<8x1xf32>
    %149 = vector.broadcast %148 : vector<8x1xf32> to vector<8x8xf32>
    %150 = arith.subf %146, %149 : vector<8x8xf32>
    %151 = math.exp %150 : vector<8x8xf32>
    %cst_50 = arith.constant dense<0.000000e+00> : vector<8xf32>
    %152 = vector.multi_reduction <add>, %151, %cst_50 [1] : vector<8x8xf32> to vector<8xf32>
    %153 = vector.shape_cast %152 : vector<8xf32> to vector<8x1xf32>
    %154 = vector.broadcast %153 : vector<8x1xf32> to vector<8x8xf32>
    %155 = arith.divf %151, %154 : vector<8x8xf32>
    %cst_51 = arith.constant dense<0.000000e+00> : vector<8x8xf32>
    %156 = tpu.matmul %155, %145, %cst_51 {dimension_numbers = #tpu.dot_dimension_numbers<[1], [0], [0], [1], [0, 0, 1, 1], [], []>} : vector<8x8xf32>, vector<8x8xf32>, vector<8x8xf32> -> vector<8x8xf32>
    %157 = vector.extract_strided_slice %2 {offsets = [24, 0], sizes = [8, 128], strides = [1, 1]} : vector<32x128xf32> to vector<8x128xf32>
    %cst_52 = arith.constant dense<0.000000e+00> : vector<8x128xf32>
    %158 = tpu.matmul %156, %157, %cst_52 {dimension_numbers = #tpu.dot_dimension_numbers<[1], [0], [0], [1], [0, 0, 1, 1], [], []>} : vector<8x8xf32>, vector<8x128xf32>, vector<8x128xf32> -> vector<8x128xf32>
    %159 = arith.addf %142, %158 : vector<8x128xf32>
    %160 = vector.broadcast %3 : vector<1x128xf32> to vector<8x128xf32>
    %161 = arith.addf %159, %160 : vector<8x128xf32>
    %c1 = arith.constant 1 : index
    %c0_53 = arith.constant 0 : index
    %c0_54 = arith.constant 0 : index
    %162 = vector.load %arg3[%c1, %c0_53, %c0_54] : memref<2x8x128xf32, #tpu.memory_space<vmem>>, vector<1x8x128xf32>
    %163 = vector.shape_cast %162 : vector<1x8x128xf32> to vector<8x128xf32>
    %164 = vector.shape_cast %161 : vector<8x128xf32> to vector<1x8x128xf32>
    tpu.vector_store %arg3[%c1, %c0_53, %c0_54], %164 {strides = array<i32>} : memref<2x8x128xf32, #tpu.memory_space<vmem>>, vector<1x8x128xf32>,
    return
  }
}

</mosaic_0001>

<bundles_post_ra>
// kernel: attention_pallas.1
= control target key start
LH: loop header
LB: loop body
LE: loop exit
PB: predicated region body
PF: predicated region fallthrough
CT: control target
= control target key end

     0   :  { %s1249_s0 = inlined_call_operand.vmem [shape: f32[48,32], index: 0, kind: input, shape index: {}]   ;;  %s1250_s1 = inlined_call_operand.vmem [shape: f32[33,96], index: 1, kind: input, shape index: {}]   ;;  %s1251_s2 = inlined_call_operand.vmem [shape: f32[33,128], index: 2, kind: input, shape index: {}]   ;;  %s1252_s3 = inlined_call_operand.hbm [shape: f32[2,8,128], index: 3, kind: output, shape index: {}]  }
   0x1   :  { %v18_v0 = vld [vmem:[%s1250_s1 + $0x18] sm:$0xff]  ;;  %v17_v1 = vld [vmem:[%s1250_s1 + $0x10] sm:$0xff]  ;;  %v16_v2 = vld [vmem:[%s1250_s1 + $0x8] sm:$0xff] }
   0x2   :  { %63 = vmatpush.msra.mxu0 %v18_v0 }
   0x4   :  { %64 = vmatpush.msra.mxu0 %v17_v1 }
   0x5   :  { %8 = vsyncpa [#allocation3], 0  ;;  %v15_v3 = vld [vmem:[%s1250_s1] sm:$0xff]  ;;  %vm32_vm0 = vcmask 261120   ;;  %v26_v5 = vld [vmem:[%s1249_s0 + $0x8] sm:$0xff]  ;;  %s1037_s5 = smov 120  }
   0x6   :  { %65 = vmatpush.msra.mxu0 %v16_v2  ;;  %v25_v4 = vld [vmem:[%s1249_s0] sm:$0xff]  ;;  %v27_v6 = vld [vmem:[%s1249_s0 + $0x10] sm:$0xff]  ;;  %v28_v7 = vld [vmem:[%s1249_s0 + $0x18] sm:$0xff]  ;;  %s1038_s6 = smov 96   ;;  %vm89_vm1 = vcmask 64512   ;;  %s1040_s7 = smov 64  }
   0x7   :  { %v1102_v8 = vld [vmem:[%s1250_s1 + $0x20] ss:$0 sm:$0xff]  ;;  %s1039_s1 = smov 88   ;;  %s1041_s8 = smov 56   ;;  %v1151_v2 = vld [vmem:[%s1251_s2 + $0x8] sm:$0xff] }
   0x8   :  { %66 = vmatpush.msra.mxu0 %v15_v3  ;;  %v29_v11 = vld [vmem:[%s1249_s0 + $0x20] sm:$0xff]  ;;  %s1042_s9 = smov 112   ;;  %s1043_s10 = smov 80  }
   0x9   :  { %925 = vmatmul.msk.f32.vlgmr.msra.gmra.mxu0 %vm32_vm0, %v25_v4  ;;  %s1044_s11 = smov 72   ;;  %s1045_s12 = smov 104   ;;  %v1145_v1 = vld [vmem:[%s1251_s2] sm:$0xff] }
   0xa   :  { %s1046_s19 = smov 40   ;;  %s913_s29 = sshll.u32 %s1252_s3, 4  ;;  %s914_s29 = int_to_ptr.hbm [resolvable:$true] %s913_s29 }
   0xb   :  { %s1049_s30 = smov 128   ;;  %s1050_s4 = smov 8  }
  0x11   :  { %926 = vmatmul.msk.f32.gmra.mxu0 %vm32_vm0, %v26_v5 }
  0x19   :  { %927 = vmatmul.msk.f32.gmra.mxu0 %vm32_vm0, %v27_v6 }
  0x21   :  { %928 = vmatmul.msk.f32.gmra.mxu0 %vm32_vm0, %v28_v7  ;;  %v30_v7 = vld [vmem:[%s1249_s0 + $0x28] sm:$0xff]  ;;  %s1047_s0 = smov 48  }
  0x29   :  { %929 = vmatmul.msk.f32.gmra.mxu0 %vm32_vm0, %v29_v11 }
  0x31   :  { %930 = vmatmul.msk.f32.gmra.mxu0 %vm32_vm0, %v30_v7 }
  0x86   :  { %v68_v9 = vpop.f32.mrf.mxu0 }
  0x87   :  { %v69_v10 = vadd.f32 %v1102_v8, %v68_v9 }
  0x89   :  { %166 = vrot.lane.b32.xlu1 %v69_v10, %s1037_s5 }
  0x8e   :  { %v1110_v12 = vpop.f32.mrf.mxu0 }
  0x96   :  { %v74_v13 = vpop.f32.mrf.mxu0 }
  0x97   :  { %v75_v14 = vadd.f32 %v1102_v8, %v74_v13 }
  0x99   :  { %87 = vrot.lane.b32.xlu0 %v75_v14, %s1038_s6 }
  0x9e   :  { %v1115_v15 = vpop.f32.mrf.mxu0 }
  0xa1   :  { %168 = vrot.lane.b32.xlu0 %v75_v14, %s1039_s1 }
  0xa6   :  { %v80_v16 = vpop.f32.mrf.mxu0 }
  0xa7   :  { %v1118_v17 = vadd.f32 %v1102_v8, %v80_v16 }
  0xa9   :  { %140 = vrot.lane.b32.xlu2 %v1118_v17, %s1040_s7 }
  0xb1   :  { %218 = vrot.lane.b32.xlu2 %v1118_v17, %s1041_s8 }
  0xfb   :  { %v167_v20 = vpop.permute.xlu1 %166 }
 0x103   :  { %v141_v23 = vpop.permute.xlu2 %140 }
 0x104   :  { %161 = vmatpush.msra.mxu2 %v141_v23 }
 0x10b   :  { %v88_v18 = vpop.permute.xlu0 %87  ;;  %v219_v26 = vpop.permute.xlu2 %218 }
 0x10c   :  { %931 = vmatpush.xpose.msk.msra.mxu1 %vm89_vm1, %v88_v18  ;;  %239 = vmatpush.msrb.mxu2 %v219_v26  ;;  %v83_v26 = vpop.f32.mrf.mxu0 }
 0x10f   :  { %932 = vmatmul.msk.f32.vlgmr.msra.gmra.mxu1 %vm89_vm1, %v69_v10 }
 0x110   :  { %262 = vmatpush.msrb.mxu1 %v1151_v2 }
 0x113   :  { %v169_v19 = vpop.permute.xlu0 %168 }
 0x114   :  { %934 = vmatpush.xpose.msk.msra.mxu3 %vm89_vm1, %v169_v19 }
 0x117   :  { %935 = vmatmul.msk.f32.vlgmr.msra.gmra.mxu3 %vm89_vm1, %v167_v20 }
 0x118   :  { %285 = vmatpush.msrb.mxu3 %v1145_v1 }
 0x18c   :  { %v112_v21 = vpop.f32.mrf.mxu1 }
 0x18d   :  { %v115_v22 = vsel %vm89_vm1, %v112_v21, -inf }
 0x18e   :  { %116 = vmax.xlane.f32.xlu1 %v115_v22 }
 0x19a   :  { %v191_v24 = vpop.f32.mrf.mxu3 }
 0x19b   :  { %v194_v25 = vsel %vm89_vm1, %v191_v24, -inf }
 0x19c   :  { %195 = vmax.xlane.f32.xlu2 %v194_v25  ;;  %v1173_v25 = vadd.f32 %v1102_v8, %v1110_v12 }
 0x1a7   :  { %290 = vrot.lane.b32.xlu1 %v69_v10, %s1042_s9 }
 0x1b4   :  { %292 = vrot.lane.b32.xlu2 %v75_v14, %s1043_s10 }
 0x201   :  { %v117_v27 = vpop.xlane.xlu1 %116 }
 0x202   :  { %v118_v28 = vsub.f32 %v112_v21, %v117_v27  ;;  %v1179_v27 = vadd.f32 %v1102_v8, %v83_v26 }
 0x204   :  { %v119_v29 = vmul.f32 1.442695, %v118_v28 }
 0x206   :  { %979 = vpow2.f32 %v119_v29 }
 0x20c   :  { %v980_v30 = vpop.eup %979 }
 0x20d   :  { %v121_v31 = vsel %vm89_vm1, %v980_v30, 0.0 }
 0x20e   :  { %122 = vadd.xlane.f32.xlu2 %v121_v31 }
 0x20f   :  { %v196_v32 = vpop.xlane.xlu2 %195 }
 0x210   :  { %v197_v33 = vsub.f32 %v191_v24, %v196_v32  ;;  %v78_v24 = vadd.f32 %v1102_v8, %v1115_v15 }
 0x212   :  { %v198_v34 = vmul.f32 1.442695, %v197_v33 }
 0x214   :  { %981 = vpow2.f32 %v198_v34 }
 0x217   :  { %v293_v37 = vpop.permute.xlu2 %292 }
 0x219   :  { %v291_v63 = vpop.permute.xlu1 %290 }
 0x21a   :  { %v982_v35 = vpop.eup %981 }
 0x21b   :  { %v200_v36 = vsel %vm89_vm1, %v982_v35, 0.0 }
 0x21c   :  { %201 = vadd.xlane.f32.xlu0 %v200_v36 }
 0x226   :  { %394 = vrot.lane.b32.xlu2 %v75_v14, %s1044_s11 }
 0x230   :  { %392 = vrot.lane.b32.xlu0 %v69_v10, %s1045_s12 }
 0x281   :  { %v123_v38 = vpop.xlane.xlu2 %122 }
 0x282   :  { %983 = vrcp.f32 %v123_v38  ;;  %v135_v42 = vand.u32 2147483648, %v123_v38  ;;  %v133_v44 = vand.u32 2147483647, %v123_v38  ;;  %vm129_vm3 = vweird.f32 %v123_v38 }
 0x284   :  { %v136_v47 = vor.u32 1.1754944e-38, %v135_v42  ;;  %vm134_vm5 = vcmp.eq.f32.partialorder %v133_v44, 8.507059e+37 }
 0x288   :  { %v984_v39 = vpop.eup %983 }
 0x289   :  { %v125_v40 = vmul.f32 %v984_v39, %v123_v38  ;;  %vm130_vm2 = vweird.f32 %v984_v39  ;;  %v395_v62 = vpop.permute.xlu2 %394 }
 0x28a   :  { %vm131_vm4 = vmor %vm129_vm3, %vm130_vm2 }
 0x28b   :  { %v126_v41 = vsub.f32 1.0, %v125_v40 }
 0x28d   :  { %v127_v43 = vmul.f32 %v984_v39, %v126_v41 }
 0x28f   :  { %v202_v45 = vpop.xlane.xlu0 %201  ;;  %v128_v46 = vadd.f32 %v984_v39, %v127_v43 }
 0x290   :  { %985 = vrcp.f32 %v202_v45  ;;  %v214_v54 = vand.u32 2147483648, %v202_v45  ;;  %v212_v56 = vand.u32 2147483647, %v202_v45  ;;  %vm208_vm7 = vweird.f32 %v202_v45 }
 0x291   :  { %v132_v48 = vsel %vm131_vm4, %v984_v39, %v128_v46 }
 0x292   :  { %v137_v49 = vsel %vm134_vm5, %v136_v47, %v132_v48  ;;  %v215_v58 = vor.u32 1.1754944e-38, %v214_v54  ;;  %vm213_vm9 = vcmp.eq.f32.partialorder %v212_v56, 8.507059e+37 }
 0x293   :  { %v138_v50 = vmul.f32 %v980_v30, %v137_v49 }
 0x295   :  { %933 = vmatmul.msk.f32.vlgmr.msra.gmra.mxu2 %vm89_vm1, %v138_v50 }
 0x296   :  { %v986_v51 = vpop.eup %985  ;;  %939 = vmatpush.xpose.msk.msra.mxu2 %vm89_vm1, %v293_v37 }
 0x297   :  { %v204_v52 = vmul.f32 %v986_v51, %v202_v45  ;;  %vm209_vm6 = vweird.f32 %v986_v51 }
 0x298   :  { %vm210_vm8 = vmor %vm208_vm7, %vm209_vm6 }
 0x299   :  { %v205_v53 = vsub.f32 1.0, %v204_v52  ;;  %v22_v52 = vld [vmem:[%s1251_s2 + $0x10] sm:$0xff] }
 0x29a   :  { %386 = vmatpush.msra.mxu3 %v22_v52 }
 0x29b   :  { %v206_v55 = vmul.f32 %v986_v51, %v205_v53 }
 0x29d   :  { %v207_v57 = vadd.f32 %v986_v51, %v206_v55 }
 0x29f   :  { %v211_v59 = vsel %vm210_vm8, %v986_v51, %v207_v57  ;;  %v1202_v57 = vld [vmem:[%s1251_s2 + $0x18] sm:$0xff] }
 0x2a0   :  { %v216_v60 = vsel %vm213_vm9, %v215_v58, %v211_v59 }
 0x2a1   :  { %v217_v61 = vmul.f32 %v982_v35, %v216_v60 }
 0x2a2   :  { %v393_v0 = vpop.permute.xlu0 %392 }
 0x2a3   :  { %936 = vmatmul.msk.f32.vlgmr.msrb.gmra.mxu2 %vm89_vm1, %v217_v61 }
 0x2a4   :  { %943 = vmatpush.xpose.msk.msrb.mxu2 %vm89_vm1, %v395_v62 }
 0x2ab   :  { %940 = vmatmul.msk.f32.vlgmr.msra.gmra.mxu2 %vm89_vm1, %v291_v63 }
 0x2b3   :  { %944 = vmatmul.msk.f32.vlgmr.msrb.gmra.mxu2 %vm89_vm1, %v393_v0 }
 0x318   :  { %v163_v3 = vpop.f32.mrf.mxu2 }
 0x319   :  { %938 = vmatmul.msk.f32.vlgmr.msrb.gmra.mxu3 %vm89_vm1, %v163_v3 }
 0x31a   :  { %488 = vmatpush.msrb.mxu3 %v1202_v57 }
 0x326   :  { %v241_v4 = vpop.f32.mrf.mxu2 }
 0x327   :  { %937 = vmatmul.msk.f32.vlgmr.msrb.gmra.mxu1 %vm89_vm1, %v241_v4  ;;  %v1213_v4 = vld [vmem:[%s1251_s2 + $0x20] ss:$0 sm:$0xff]  ;;  %s1048_s2 = smov [#allocation2]  }
 0x328   :  { %s911_s26 = sshll.u32 %s1048_s2, 4  ;;  %s912_s26 = int_to_ptr.vmem [resolvable:$true] %s911_s26 }
 0x32e   :  { %v315_v5 = vpop.f32.mrf.mxu2 }
 0x32f   :  { %v318_v6 = vsel %vm89_vm1, %v315_v5, -inf }
 0x330   :  { %319 = vmax.xlane.f32.xlu2 %v318_v6 }
 0x336   :  { %v417_v9 = vpop.f32.mrf.mxu2 }
 0x337   :  { %v420_v10 = vsel %vm89_vm1, %v417_v9, -inf }
 0x338   :  { %421 = vmax.xlane.f32.xlu1 %v420_v10 }
 0x351   :  { %444 = vrot.lane.b32.xlu1 %v1118_v17, %s1046_s19 }
 0x39c   :  { %v287_v62 = vpop.f32.mrf.mxu3 }
 0x3a3   :  { %v320_v11 = vpop.xlane.xlu2 %319 }
 0x3a4   :  { %v321_v13 = vsub.f32 %v315_v5, %v320_v11  ;;  %v264_v58 = vpop.f32.mrf.mxu1 }
 0x3a5   :  { %v288_v0 = vadd.f32 %v287_v62, %v264_v58 }
 0x3a6   :  { %v322_v14 = vmul.f32 1.442695, %v321_v13 }
 0x3a8   :  { %987 = vpow2.f32 %v322_v14 }
 0x3ab   :  { %v422_v16 = vpop.xlane.xlu1 %421 }
 0x3ac   :  { %v423_v18 = vsub.f32 %v417_v9, %v422_v16 }
 0x3ae   :  { %v988_v19 = vpop.eup %987  ;;  %v424_v20 = vmul.f32 1.442695, %v423_v18 }
 0x3af   :  { %v324_v21 = vsel %vm89_vm1, %v988_v19, 0.0 }
 0x3b0   :  { %989 = vpow2.f32 %v424_v20  ;;  %325 = vadd.xlane.f32.xlu0 %v324_v21 }
 0x3b6   :  { %v990_v22 = vpop.eup %989 }
 0x3b7   :  { %v426_v23 = vsel %vm89_vm1, %v990_v22, 0.0 }
 0x3b8   :  { %427 = vadd.xlane.f32.xlu2 %v426_v23 }
 0x3c3   :  { %v445_v38 = vpop.permute.xlu1 %444 }
 0x3c4   :  { %578 = vrot.lane.b32.xlu0 %v78_v24, %s1039_s1 }
 0x3d0   :  { %342 = vrot.lane.b32.xlu2 %v1118_v17, %s1047_s0 }
 0x3d8   :  { %576 = vrot.lane.b32.xlu2 %v1173_v25, %s1037_s5 }
 0x3e0   :  { %498 = vrot.lane.b32.xlu2 %v78_v24, %s1038_s6 }
 0x3e8   :  { %628 = vrot.lane.b32.xlu2 %v1179_v27, %s1041_s8 }
 0x3f0   :  { %702 = vrot.lane.b32.xlu2 %v78_v24, %s1043_s10 }
 0x3f8   :  { %700 = vrot.lane.b32.xlu2 %v1173_v25, %s1042_s9 }
 0x400   :  { %804 = vrot.lane.b32.xlu2 %v78_v24, %s1044_s11 }
 0x423   :  { %v326_v12 = vpop.xlane.xlu0 %325 }
 0x424   :  { %991 = vrcp.f32 %v326_v12  ;;  %v338_v30 = vand.u32 2147483648, %v326_v12  ;;  %v336_v31 = vand.u32 2147483647, %v326_v12  ;;  %vm332_vm11 = vweird.f32 %v326_v12 }
 0x426   :  { %v339_v34 = vor.u32 1.1754944e-38, %v338_v30  ;;  %vm337_vm13 = vcmp.eq.f32.partialorder %v336_v31, 8.507059e+37 }
 0x42a   :  { %v992_v15 = vpop.eup %991 }
 0x42b   :  { %v328_v17 = vmul.f32 %v992_v15, %v326_v12  ;;  %v428_v28 = vpop.xlane.xlu2 %427  ;;  %vm333_vm10 = vweird.f32 %v992_v15 }
 0x42c   :  { %993 = vrcp.f32 %v428_v28  ;;  %vm334_vm12 = vmor %vm332_vm11, %vm333_vm10  ;;  %v440_v42 = vand.u32 2147483648, %v428_v28  ;;  %v438_v44 = vand.u32 2147483647, %v428_v28  ;;  %vm434_vm15 = vweird.f32 %v428_v28 }
 0x42d   :  { %v329_v29 = vsub.f32 1.0, %v328_v17 }
 0x42e   :  { %v441_v46 = vor.u32 1.1754944e-38, %v440_v42  ;;  %vm439_vm2 = vcmp.eq.f32.partialorder %v438_v44, 8.507059e+37 }
 0x42f   :  { %v330_v8 = vmul.f32 %v992_v15, %v329_v29 }
 0x431   :  { %v331_v32 = vadd.f32 %v992_v15, %v330_v8 }
 0x432   :  { %v994_v33 = vpop.eup %993 }
 0x433   :  { %v335_v35 = vsel %vm334_vm12, %v992_v15, %v331_v32  ;;  %v430_v36 = vmul.f32 %v994_v33, %v428_v28  ;;  %v343_v37 = vpop.permute.xlu2 %342  ;;  %vm435_vm14 = vweird.f32 %v994_v33 }
 0x434   :  { %v340_v39 = vsel %vm337_vm13, %v339_v34, %v335_v35  ;;  %363 = vmatpush.msra.mxu1 %v343_v37  ;;  %vm436_vm0 = vmor %vm434_vm15, %vm435_vm14 }
 0x435   :  { %v431_v40 = vsub.f32 1.0, %v430_v36  ;;  %v341_v41 = vmul.f32 %v988_v19, %v340_v39 }
 0x436   :  { %465 = vmatpush.msrb.mxu1 %v445_v38  ;;  %v579_v60 = vpop.permute.xlu0 %578 }
 0x437   :  { %v432_v43 = vmul.f32 %v994_v33, %v431_v40  ;;  %941 = vmatmul.msk.f32.vlgmr.msra.gmra.mxu1 %vm89_vm1, %v341_v41 }
 0x439   :  { %v433_v45 = vadd.f32 %v994_v33, %v432_v43 }
 0x43b   :  { %v437_v47 = vsel %vm436_vm0, %v994_v33, %v433_v45  ;;  %v577_v48 = vpop.permute.xlu2 %576 }
 0x43c   :  { %v442_v49 = vsel %vm439_vm2, %v441_v46, %v437_v47 }
 0x43d   :  { %v443_v50 = vmul.f32 %v990_v22, %v442_v49 }
 0x43f   :  { %945 = vmatmul.msk.f32.vlgmr.msrb.gmra.mxu1 %vm89_vm1, %v443_v50 }
 0x443   :  { %v499_v51 = vpop.permute.xlu2 %498 }
 0x444   :  { %947 = vmatpush.xpose.msk.msra.mxu2 %vm89_vm1, %v499_v51 }
 0x447   :  { %948 = vmatmul.msk.f32.vlgmr.msra.gmra.mxu2 %vm89_vm1, %v1173_v25 }
 0x44b   :  { %v629_v53 = vpop.permute.xlu2 %628 }
 0x44c   :  { %649 = vmatpush.msrb.mxu2 %v629_v53 }
 0x453   :  { %v703_v54 = vpop.permute.xlu2 %702 }
 0x454   :  { %955 = vmatpush.xpose.msk.msra.mxu2 %vm89_vm1, %v703_v54 }
 0x45b   :  { %v1196_v55 = vpop.permute.xlu2 %700 }
 0x463   :  { %v805_v56 = vpop.permute.xlu2 %804 }
 0x464   :  { %959 = vmatpush.xpose.msk.msrb.mxu0 %vm89_vm1, %v805_v56 }
 0x4b4   :  { %v365_v59 = vpop.f32.mrf.mxu1 }
 0x4b5   :  { %942 = vmatmul.msk.f32.vlgmr.msra.gmra.mxu3 %vm89_vm1, %v365_v59 }
 0x4b6   :  { %950 = vmatpush.xpose.msk.msra.mxu3 %vm89_vm1, %v579_v60 }
 0x4bc   :  { %v467_v61 = vpop.f32.mrf.mxu1 }
 0x4bd   :  { %946 = vmatmul.msk.f32.vlgmr.msrb.gmra.mxu3 %vm89_vm1, %v467_v61 }
 0x4be   :  { %695 = vmatpush.msrb.mxu3 %v1145_v1 }
 0x4c5   :  { %951 = vmatmul.msk.f32.vlgmr.msra.gmra.mxu3 %vm89_vm1, %v577_v48 }
 0x4c6   :  { %796 = vmatpush.msra.mxu3 %v22_v52 }
 0x4ca   :  { %v522_v18 = vpop.f32.mrf.mxu2 }
 0x4cb   :  { %v525_v20 = vsel %vm89_vm1, %v522_v18, -inf }
 0x538   :  { %v388_v63 = vpop.f32.mrf.mxu3 }
 0x539   :  { %v391_v3 = vadd.f32 %v388_v63, %v288_v0 }
 0x540   :  { %v490_v5 = vpop.f32.mrf.mxu3 }
 0x541   :  { %v493_v6 = vadd.f32 %v490_v5, %v391_v3 }
 0x543   :  { %v495_v7 = vadd.f32 %v1213_v4, %v493_v6 }
 0x545   :  { %496 = vst [vmem:[#allocation2] sm:$0xff] %v495_v7 }
 0x548   :  { %v601_v9 = vpop.f32.mrf.mxu3 }
 0x549   :  { %v604_v1 = vsel %vm89_vm1, %v601_v9, -inf }
 0x54a   :  { %605 = vmax.xlane.f32.xlu0 %v604_v1 }
 0x55e   :  { %802 = vrot.lane.b32.xlu0 %v1173_v25, %s1045_s12 }
 0x5bd   :  { %v606_v10 = vpop.xlane.xlu0 %605 }
 0x5be   :  { %v607_v11 = vsub.f32 %v601_v9, %v606_v10 }
 0x5c0   :  { %v608_v13 = vmul.f32 1.442695, %v607_v11 }
 0x5c2   :  { %995 = vpow2.f32 %v608_v13 }
 0x5c8   :  { %v996_v14 = vpop.eup %995 }
 0x5c9   :  { %v610_v16 = vsel %vm89_vm1, %v996_v14, 0.0 }
 0x5ca   :  { %611 = vadd.xlane.f32.xlu1 %v610_v16 }
 0x5d0   :  { %v803_v19 = vpop.permute.xlu0 %802 }
 0x5d1   :  { %960 = vmatmul.msk.f32.vlgmr.msrb.gmra.mxu0 %vm89_vm1, %v803_v19 }
 0x5d2   :  { %526 = vmax.xlane.f32.xlu1 %v525_v20 }
 0x63d   :  { %v612_v21 = vpop.xlane.xlu1 %611 }
 0x63e   :  { %997 = vrcp.f32 %v612_v21  ;;  %v624_v12 = vand.u32 2147483648, %v612_v21  ;;  %v622_v17 = vand.u32 2147483647, %v612_v21  ;;  %vm618_vm4 = vweird.f32 %v612_v21 }
 0x640   :  { %v625_v30 = vor.u32 1.1754944e-38, %v624_v12  ;;  %vm623_vm6 = vcmp.eq.f32.partialorder %v622_v17, 8.507059e+37 }
 0x644   :  { %v998_v22 = vpop.eup %997 }
 0x645   :  { %v614_v23 = vmul.f32 %v998_v22, %v612_v21  ;;  %v527_v24 = vpop.xlane.xlu1 %526  ;;  %vm619_vm3 = vweird.f32 %v998_v22 }
 0x646   :  { %v528_v25 = vsub.f32 %v522_v18, %v527_v24  ;;  %vm620_vm5 = vmor %vm618_vm4, %vm619_vm3 }
 0x647   :  { %v615_v26 = vsub.f32 1.0, %v614_v23 }
 0x648   :  { %v529_v28 = vmul.f32 1.442695, %v528_v25 }
 0x649   :  { %v616_v15 = vmul.f32 %v998_v22, %v615_v26 }
 0x64a   :  { %999 = vpow2.f32 %v529_v28 }
 0x64b   :  { %v617_v29 = vadd.f32 %v998_v22, %v616_v15 }
 0x64d   :  { %v621_v8 = vsel %vm620_vm5, %v998_v22, %v617_v29 }
 0x64e   :  { %v626_v31 = vsel %vm623_vm6, %v625_v30, %v621_v8  ;;  %v827_v32 = vpop.f32.mrf.mxu0 }
 0x64f   :  { %v830_v33 = vsel %vm89_vm1, %v827_v32, -inf  ;;  %v627_v34 = vmul.f32 %v996_v14, %v626_v31 }
 0x650   :  { %831 = vmax.xlane.f32.xlu1 %v830_v33  ;;  %v1000_v35 = vpop.eup %999 }
 0x651   :  { %952 = vmatmul.msk.f32.vlgmr.msrb.gmra.mxu2 %vm89_vm1, %v627_v34  ;;  %v531_v36 = vsel %vm89_vm1, %v1000_v35, 0.0 }
 0x658   :  { %532 = vadd.xlane.f32.xlu1 %v531_v36 }
 0x659   :  { %956 = vmatmul.msk.f32.vlgmr.msra.gmra.mxu2 %vm89_vm1, %v1196_v55 }
 0x6c3   :  { %v832_v37 = vpop.xlane.xlu1 %831 }
 0x6c4   :  { %v833_v38 = vsub.f32 %v827_v32, %v832_v37 }
 0x6c6   :  { %v834_v39 = vmul.f32 1.442695, %v833_v38 }
 0x6c8   :  { %1001 = vpow2.f32 %v834_v39 }
 0x6cb   :  { %v533_v45 = vpop.xlane.xlu1 %532 }
 0x6cc   :  { %1003 = vrcp.f32 %v533_v45  ;;  %v545_v56 = vand.u32 2147483648, %v533_v45  ;;  %vm539_vm8 = vweird.f32 %v533_v45  ;;  %v543_v59 = vand.u32 2147483647, %v533_v45 }
 0x6ce   :  { %v1002_v40 = vpop.eup %1001  ;;  %v546_v62 = vor.u32 1.1754944e-38, %v545_v56  ;;  %vm544_vm10 = vcmp.eq.f32.partialorder %v543_v59, 8.507059e+37 }
 0x6cf   :  { %v836_v41 = vsel %vm89_vm1, %v1002_v40, 0.0 }
 0x6d0   :  { %837 = vadd.xlane.f32.xlu1 %v836_v41 }
 0x6d2   :  { %v1004_v46 = vpop.eup %1003 }
 0x6d3   :  { %v535_v48 = vmul.f32 %v1004_v46, %v533_v45  ;;  %vm540_vm7 = vweird.f32 %v1004_v46 }
 0x6d4   :  { %v651_v42 = vpop.f32.mrf.mxu2  ;;  %vm541_vm9 = vmor %vm539_vm8, %vm540_vm7 }
 0x6d5   :  { %v536_v49 = vsub.f32 1.0, %v535_v48 }
 0x6d7   :  { %v537_v51 = vmul.f32 %v1004_v46, %v536_v49 }
 0x6d9   :  { %v538_v53 = vadd.f32 %v1004_v46, %v537_v51 }
 0x6db   :  { %v542_v60 = vsel %vm541_vm9, %v1004_v46, %v538_v53 }
 0x6dc   :  { %v725_v43 = vpop.f32.mrf.mxu2  ;;  %v547_v63 = vsel %vm544_vm10, %v546_v62, %v542_v60 }
 0x6dd   :  { %v728_v44 = vsel %vm89_vm1, %v725_v43, -inf  ;;  %v548_v7 = vmul.f32 %v1000_v35, %v547_v63 }
 0x6de   :  { %729 = vmax.xlane.f32.xlu2 %v728_v44 }
 0x6e9   :  { %550 = vrot.lane.b32.xlu1 %v1179_v27, %s1040_s7 }
 0x6f1   :  { %854 = vrot.lane.b32.xlu1 %v1179_v27, %s1046_s19 }
 0x6f6   :  { %752 = vrot.lane.b32.xlu2 %v1179_v27, %s1047_s0 }
 0x743   :  { %v838_v47 = vpop.xlane.xlu1 %837 }
 0x744   :  { %1005 = vrcp.f32 %v838_v47  ;;  %v850_v3 = vand.u32 2147483648, %v838_v47  ;;  %vm844_vm12 = vweird.f32 %v838_v47  ;;  %v848_v5 = vand.u32 2147483647, %v838_v47 }
 0x746   :  { %v851_v11 = vor.u32 1.1754944e-38, %v850_v3  ;;  %vm849_vm14 = vcmp.eq.f32.partialorder %v848_v5, 8.507059e+37 }
 0x74a   :  { %v1006_v50 = vpop.eup %1005 }
 0x74b   :  { %v840_v52 = vmul.f32 %v1006_v50, %v838_v47  ;;  %vm845_vm11 = vweird.f32 %v1006_v50 }
 0x74c   :  { %vm846_vm13 = vmor %vm844_vm12, %vm845_vm11 }
 0x74d   :  { %v841_v54 = vsub.f32 1.0, %v840_v52 }
 0x74f   :  { %v842_v61 = vmul.f32 %v1006_v50, %v841_v54 }
 0x751   :  { %v730_v55 = vpop.xlane.xlu2 %729  ;;  %v843_v0 = vadd.f32 %v1006_v50, %v842_v61 }
 0x752   :  { %v731_v58 = vsub.f32 %v725_v43, %v730_v55 }
 0x753   :  { %v847_v1 = vsel %vm846_vm13, %v1006_v50, %v843_v0 }
 0x754   :  { %v732_v27 = vmul.f32 1.442695, %v731_v58  ;;  %v852_v14 = vsel %vm849_vm14, %v851_v11, %v847_v1 }
 0x755   :  { %v853_v18 = vmul.f32 %v1002_v40, %v852_v14 }
 0x756   :  { %1007 = vpow2.f32 %v732_v27 }
 0x759   :  { %v753_v13 = vpop.permute.xlu2 %752 }
 0x75b   :  { %v551_v6 = vpop.permute.xlu1 %550 }
 0x75c   :  { %v1008_v9 = vpop.eup %1007  ;;  %571 = vmatpush.msra.mxu1 %v551_v6 }
 0x75d   :  { %949 = vmatmul.msk.f32.vlgmr.msra.gmra.mxu1 %vm89_vm1, %v548_v7  ;;  %v734_v10 = vsel %vm89_vm1, %v1008_v9, 0.0 }
 0x75e   :  { %672 = vmatpush.msrb.mxu1 %v1151_v2  ;;  %735 = vadd.xlane.f32.xlu0 %v734_v10 }
 0x760   :  { %773 = vmatpush.msra.mxu1 %v753_v13 }
 0x763   :  { %v855_v16 = vpop.permute.xlu1 %854 }
 0x764   :  { %875 = vmatpush.msrb.mxu2 %v855_v16 }
 0x765   :  { %953 = vmatmul.msk.f32.vlgmr.msrb.gmra.mxu1 %vm89_vm1, %v651_v42  ;;  %961 = vmatmul.msk.f32.vlgmr.msrb.gmra.mxu2 %vm89_vm1, %v853_v18 }
 0x766   :  { %898 = vmatpush.msrb.mxu1 %v1202_v57 }
 0x7d1   :  { %v736_v19 = vpop.xlane.xlu0 %735 }
 0x7d2   :  { %1009 = vrcp.f32 %v736_v19  ;;  %v748_v2 = vand.u32 2147483648, %v736_v19  ;;  %v746_v25 = vand.u32 2147483647, %v736_v19  ;;  %vm742_vm0 = vweird.f32 %v736_v19 }
 0x7d4   :  { %v749_v12 = vor.u32 1.1754944e-38, %v748_v2  ;;  %vm747_vm3 = vcmp.eq.f32.partialorder %v746_v25, 8.507059e+37 }
 0x7d8   :  { %v1010_v20 = vpop.eup %1009 }
 0x7d9   :  { %v738_v21 = vmul.f32 %v1010_v20, %v736_v19  ;;  %vm743_vm15 = vweird.f32 %v1010_v20 }
 0x7da   :  { %v573_v22 = vpop.f32.mrf.mxu1  ;;  %vm744_vm2 = vmor %vm742_vm0, %vm743_vm15 }
 0x7db   :  { %v739_v23 = vsub.f32 1.0, %v738_v21  ;;  %954 = vmatmul.msk.f32.vlgmr.msrb.gmra.mxu3 %vm89_vm1, %v573_v22 }
 0x7dd   :  { %v740_v24 = vmul.f32 %v1010_v20, %v739_v23 }
 0x7df   :  { %v741_v26 = vadd.f32 %v1010_v20, %v740_v24 }
 0x7e1   :  { %v745_v15 = vsel %vm744_vm2, %v1010_v20, %v741_v26 }
 0x7e2   :  { %v750_v17 = vsel %vm747_vm3, %v749_v12, %v745_v15  ;;  %v674_v29 = vpop.f32.mrf.mxu1 }
 0x7e3   :  { %v751_v57 = vmul.f32 %v1008_v9, %v750_v17 }
 0x7e5   :  { %957 = vmatmul.msk.f32.vlgmr.msra.gmra.mxu1 %vm89_vm1, %v751_v57 }
 0x7e8   :  { %v877_v28 = vpop.f32.mrf.mxu2 }
 0x7ed   :  { %962 = vmatmul.msk.f32.vlgmr.msrb.gmra.mxu1 %vm89_vm1, %v877_v28 }
 0x85e   :  { %v697_v8 = vpop.f32.mrf.mxu3 }
 0x85f   :  { %v698_v31 = vadd.f32 %v697_v8, %v674_v29 }
 0x862   :  { %v775_v30 = vpop.f32.mrf.mxu1 }
 0x863   :  { %958 = vmatmul.msk.f32.vlgmr.msra.gmra.mxu3 %vm89_vm1, %v775_v30 }
 0x86a   :  { %v900_v34 = vpop.f32.mrf.mxu1 }
 0x8e6   :  { %v798_v32 = vpop.f32.mrf.mxu3 }
 0x8e7   :  { %v801_v33 = vadd.f32 %v798_v32, %v698_v31 }
 0x8e9   :  { %v903_v35 = vadd.f32 %v900_v34, %v801_v33 }
 0x8eb   :  { %v904_v36 = vadd.f32 %v1213_v4, %v903_v35 }
 0x8ed   :  { %906 = vst [vmem:[#allocation2 + $0x8] sm:$0xff] %v904_v36 }
 0x8ee   :  { %919 = dma.vmem_to_hbm [thread:$0]  %s912_s26, 256, %s914_s29, [#allocation3], %s1049_s30, %s1049_s30, %s1050_s4  }
 0x8ef   :  { %1035 = dma.done.wait [#allocation3], 256  }
 0x8f0   :  { %1036 = vsyncadd [#allocation3], 4294967040 }
 0x8f1   :  { %924 = vsyncpa [#allocation3], 1 }

</bundles_post_ra>
